<compile_context>
chip_gen: v7x
topology: tpu7x:2x2x1
jax: 0.10.0
libtpu: 0.0.40
codegen_flags: <defaults>
</compile_context>

<pallas_src>
import functools

import jax
import jax.numpy as jnp
from jax import lax
from jax.experimental import pallas as pl
from jax.experimental.pallas import tpu as pltpu

S_DEF, B_DEF, C_DEF = 7, 2, 20   # module defaults (the kernel assumes B=2)

TILE_N = 16384   # cells per grid block (lane axis); multiple of CHUNK_N
CHUNK_N = 256    # cells per in-kernel compute chunk; multiple of 128


def _iou_vs_target0(pbox, tbox, has_obj):
    """IoU of a predicted box vs. target box 0, per cell.

    pbox, tbox: [5, W] rows (x1, y1, x2, y2, conf); has_obj: [1, W] bool.
    Raw corner format, as in the reference.  `union` is forced to 1 on
    non-object lanes so no div-by-zero happens there; any remaining garbage
    on masked lanes is removed later by jnp.where selects keyed on has_obj.
    """
    px1, py1, px2, py2 = pbox[0:1], pbox[1:2], pbox[2:3], pbox[3:4]
    tx1, ty1, tx2, ty2 = tbox[0:1], tbox[1:2], tbox[2:3], tbox[3:4]
    iw = jnp.maximum(jnp.minimum(px2, tx2) - jnp.maximum(px1, tx1), 0.0)
    ih = jnp.maximum(jnp.minimum(py2, ty2) - jnp.maximum(py1, ty1), 0.0)
    inter = iw * ih
    area_p = (px2 - px1) * (py2 - py1)
    area_t = (tx2 - tx1) * (ty2 - ty1)
    union = jnp.where(has_obj, area_p + area_t - inter, 1.0)
    return inter / union


def _yolo_loss_kernel(p_ref, t_ref, out_ref, *, n_cells, tile_n, chunk_n,
                      steps, unroll):
    """p_ref, t_ref: [30, tile_n] VMEM blocks (feature-major, lane-dense).
    out_ref: [8, chunk_n] f32 resident output block (per-core accumulator):
      row 0 = xy, 1 = wh, 2 = obj, 3 = noobj, 4 = class, 5..7 unused (zero).

    Feature rows: 0..4 = box0 (x1,y1,x2,y2,conf), 5..9 = box1, 10..29 = classes.
    """
    c = pl.program_id(0)          # TensorCore split ("parallel")
    i = pl.program_id(1)          # block step within the split ("arbitrary")

    @pl.when(i == 0)
    def _init():
        out_ref[...] = jnp.zeros_like(out_ref)

    # Unclamped block id.  The input index_map clamps to the last in-range
    # block so the DMA stays in bounds; keeping the raw id here makes the
    # global cell index of any spare (clamped) block land >= n_cells, so all
    # of its lanes are masked out below.
    base = (c * steps + i) * tile_n
    n_chunks = tile_n // chunk_n

    def chunk_body(j, carry):
        a_xy, a_wh, a_obj, a_noobj, a_cls = carry
        off = pl.multiple_of(j * chunk_n, chunk_n)
        p = p_ref[:, pl.ds(off, chunk_n)].astype(jnp.float32)   # [30, chunk]
        t = t_ref[:, pl.ds(off, chunk_n)].astype(jnp.float32)

        # Global cell index of each lane; lanes past the real problem size
        # (ragged last block / spare block of the 2-way split) are masked out.
        gidx = base + off + lax.broadcasted_iota(jnp.int32, (1, chunk_n), 1)
        lane_ok = gidx < n_cells

        t_conf0 = t[4:5, :]
        has_obj = lane_ok & (t_conf0 > 0.0)      # "coord" cells
        noobj = lane_ok & (t_conf0 == 0.0)       # "no-object" cells

        iou0 = _iou_vs_target0(p[0:5], t[0:5], has_obj)
        iou1 = _iou_vs_target0(p[5:10], t[0:5], has_obj)
        resp1 = iou1 > iou0                      # responsible box (ties -> box 0)
        max_iou = jnp.maximum(iou0, iou1)

        # Vectorized responsible-box select: [5, chunk]
        pr = jnp.where(resp1, p[5:10], p[0:5])
        tr = jnp.where(resp1, t[5:10], t[0:5])

        # loss_xy: (dx^2 + dy^2) over responsible boxes at object cells
        xy = (pr[0:1] - tr[0:1]) ** 2 + (pr[1:2] - tr[1:2]) ** 2
        # loss_wh: sqrt on w,h (guarded so masked-out lanes cannot produce NaN)
        spw = jnp.sqrt(jnp.where(has_obj, pr[2:3], 0.0))
        sph = jnp.sqrt(jnp.where(has_obj, pr[3:4], 0.0))
        stw = jnp.sqrt(jnp.where(has_obj, tr[2:3], 0.0))
        sth = jnp.sqrt(jnp.where(has_obj, tr[3:4], 0.0))
        wh = (spw - stw) ** 2 + (sph - sth) ** 2
        # loss_obj: responsible predicted confidence vs. max IoU
        ob = (pr[4:5] - max_iou) ** 2
        # loss_noobj: both predicted confidences (rows 4, 9) at no-object cells
        nob = (p[4:5] - t[4:5]) ** 2 + (p[9:10] - t[9:10]) ** 2
        # loss_class: class scores at object cells
        dcls = p[10:30] - t[10:30]
        cls = jnp.sum(dcls * dcls, axis=0, keepdims=True)

        # Accumulate via selects (NOT mask multiplies) so NaN/Inf from
        # out-of-range lanes can never leak into the running sums.
        return (a_xy + jnp.where(has_obj, xy, 0.0),
                a_wh + jnp.where(has_obj, wh, 0.0),
                a_obj + jnp.where(has_obj, ob, 0.0),
                a_noobj + jnp.where(noobj, nob, 0.0),
                a_cls + jnp.where(has_obj, cls, 0.0))

    zero = jnp.zeros((1, chunk_n), jnp.float32)
    a_xy, a_wh, a_obj, a_noobj, a_cls = lax.fori_loop(
        0, n_chunks, chunk_body, (zero, zero, zero, zero, zero), unroll=unroll)

    # One lane-wide add per loss term per grid step; the cross-lane reduction
    # happens once, on the tiny [splits, 8, chunk] result, on the host.
    out_ref[0:1, :] += a_xy
    out_ref[1:2, :] += a_wh
    out_ref[2:3, :] += a_obj
    out_ref[3:4, :] += a_noobj
    out_ref[4:5, :] += a_cls


def yolo_v1_loss(pred, target, S=S_DEF, B=B_DEF, C=C_DEF, *,
                 tile_cells=TILE_N, chunk_cells=CHUNK_N):
    assert B == 2, "kernel is written for the module default B=2"
    assert chunk_cells % 128 == 0 and tile_cells % chunk_cells == 0
    E = B * 5 + C                            # 30
    batch = pred.shape[0]
    N = batch * S * S
    assert pred.shape[-1] == E and target.shape[-1] == E

    def prep(x):
        x = x.reshape(N, E)
        if x.dtype not in (jnp.float32, jnp.bfloat16):
            x = x.astype(jnp.float32)
        return x.T                           # feature-major [30, N], lane-dense

    p = prep(pred)
    t = prep(target)

    # Lane (cell) tiling: tile is a multiple of chunk_cells (and of 128).
    tile = min(tile_cells, pl.cdiv(N, chunk_cells) * chunk_cells)
    if tile > N:
        # Tiny problems only: cheap pad of the (already-copied) transposed
        # arrays so the single block never exceeds the array extent.
        p = jnp.pad(p, ((0, 0), (0, tile - N)))
        t = jnp.pad(t, ((0, 0), (0, tile - N)))
    n_blocks = pl.cdiv(N, tile)

    # v7x: 2 TensorCores share HBM; split the block range over a leading
    # "parallel" axis.  Serializes harmlessly on single-TC chips.
    num_splits = 2 if n_blocks >= 2 else 1
    steps = pl.cdiv(n_blocks, num_splits)

    def in_map(c, i):
        # Clamp so the spare block of an odd split stays in range; the kernel
        # masks its contribution via the (unclamped) global cell index.
        return (0, jnp.minimum(c * steps + i, n_blocks - 1))

    n_chunks = tile // chunk_cells
    kernel = functools.partial(
        _yolo_loss_kernel, n_cells=N, tile_n=tile, chunk_n=chunk_cells,
        steps=steps, unroll=(n_chunks <= 8))

    in_spec = pl.BlockSpec((E, tile), in_map)
    out = pl.pallas_call(
        kernel,
        out_shape=jax.ShapeDtypeStruct((num_splits, 8, chunk_cells), jnp.float32),
        grid=(num_splits, steps),
        in_specs=[in_spec, in_spec],
        out_specs=pl.BlockSpec((None, 8, chunk_cells), lambda c, i: (c, 0, 0)),
        compiler_params=pltpu.CompilerParams(
            dimension_semantics=("parallel", "arbitrary"),
            vmem_limit_bytes=32 * 1024 * 1024),
        cost_estimate=pl.CostEstimate(
            flops=120 * N, transcendentals=4 * N,
            bytes_accessed=2 * N * E * p.dtype.itemsize),
    )(p, t)

    sums = jnp.sum(out, axis=(0, 2))         # tiny final reduction on the host
    return sums[0], sums[1], sums[2], sums[3], sums[4]


def yolo_v1_loss_ref(pred, target, S=S_DEF, B=B_DEF, C=C_DEF):
    """Pure-JAX reference (same masked-sum reformulation, unpadded)."""
    E = B * 5 + C
    p = pred.reshape(-1, E).astype(jnp.float32)
    t = target.reshape(-1, E).astype(jnp.float32)
    has_obj = t[:, 4] > 0
    noobj = t[:, 4] == 0

    def iou(pb):
        w = jnp.maximum(jnp.minimum(pb[:, 2], t[:, 2]) - jnp.maximum(pb[:, 0], t[:, 0]), 0.0)
        h = jnp.maximum(jnp.minimum(pb[:, 3], t[:, 3]) - jnp.maximum(pb[:, 1], t[:, 1]), 0.0)
        inter = w * h
        union = ((pb[:, 2] - pb[:, 0]) * (pb[:, 3] - pb[:, 1])
                 + (t[:, 2] - t[:, 0]) * (t[:, 3] - t[:, 1]) - inter)
        return inter / jnp.where(has_obj, union, 1.0)

    iou0, iou1 = iou(p[:, 0:5]), iou(p[:, 5:10])
    resp1 = iou1 > iou0
    max_iou = jnp.maximum(iou0, iou1)
    pr = jnp.where(resp1[:, None], p[:, 5:10], p[:, 0:5])
    tr = jnp.where(resp1[:, None], t[:, 5:10], t[:, 0:5])
    m = has_obj.astype(jnp.float32)
    nm = noobj.astype(jnp.float32)
    loss_xy = jnp.sum(m * jnp.sum((pr[:, :2] - tr[:, :2]) ** 2, -1))
    loss_wh = jnp.sum(m * jnp.sum(
        (jnp.sqrt(jnp.where(has_obj[:, None], pr[:, 2:4], 0.0))
         - jnp.sqrt(jnp.where(has_obj[:, None], tr[:, 2:4], 0.0))) ** 2, -1))
    loss_obj = jnp.sum(m * (pr[:, 4] - max_iou) ** 2)
    loss_noobj = jnp.sum(nm * ((p[:, 4] - t[:, 4]) ** 2 + (p[:, 9] - t[:, 9]) ** 2))
    loss_class = jnp.sum(m * jnp.sum((p[:, 10:] - t[:, 10:]) ** 2, -1))
    return loss_xy, loss_wh, loss_obj, loss_noobj, loss_class


if __name__ == "__main__":
    key = jax.random.PRNGKey(0)
    k1, k2, k3, k4, k5, k6 = jax.random.split(key, 6)

    def make_inputs(batch, kp, ko, kt):
        E = B_DEF * 5 + C_DEF
        # predictions in [0,1) so sqrt(w), sqrt(h) is well defined (as in real YOLO outputs)
        pred = jax.random.uniform(kp, (batch, S_DEF, S_DEF, E), dtype=jnp.float32)
        obj = (jax.random.uniform(ko, (batch, S_DEF, S_DEF)) > 0.5).astype(jnp.float32)
        target = jax.random.uniform(kt, (batch, S_DEF, S_DEF, E), dtype=jnp.float32)
        target = target.at[..., 4].set(obj).at[..., 9].set(obj)
        return pred, target

    def check(pred, target, **kw):
        out = jax.block_until_ready(yolo_v1_loss(pred, target, **kw))
        ref = yolo_v1_loss_ref(pred, target)
        for a, b in zip(out, ref):
            assert jnp.allclose(a, b, rtol=1e-4, atol=1e-3), (a, b)

    # Small module-default problem: batch=2 -> N=98 (single 256-lane block).
    pred_s, target_s = make_inputs(2, k1, k2, k3)
    check(pred_s, target_s)

    # Larger problem: batch=48 -> N=2352.  With tile_cells=512 this runs a
    # (2, 3) grid: 2-way TensorCore split, multi-step accumulation, a ragged
    # last block, and one clamped/masked spare block (5 real blocks).
    pred_l, target_l = make_inputs(48, k4, k5, k6)
    check(pred_l, target_l, tile_cells=512)
    # Default-tile path (whole problem in one lane-dense block).
    check(pred_l, target_l)

    print("KERNEL_OK")
</pallas_src>

<mosaic_0001>
module attributes {stable_mosaic.version = 11 : i64} {
  func.func @_yolo_loss_kernel(%arg0: i32, %arg1: i32, %arg2: memref<30x256xf32, #tpu.memory_space<vmem>>, %arg3: memref<30x256xf32, #tpu.memory_space<vmem>>, %arg4: memref<1x8x256xf32, #tpu.memory_space<vmem>>) attributes {dimension_semantics = [#tpu.dimension_semantics<parallel>, #tpu.dimension_semantics<arbitrary>], iteration_bounds = array<i64: 1, 1>, scalar_prefetch = 0 : i64, scratch_operands = 0 : i64, tpu.core_type = #tpu.core_type<tc>, window_params = [{transform_indices = @transform_0, window_bounds = array<i64: 30, 256>}, {transform_indices = @transform_1, window_bounds = array<i64: 30, 256>}, {transform_indices = @transform_2, window_bounds = array<i64: 1, 8, 256>}]} {
    %c0_i32 = arith.constant 0 : i32
    %0 = arith.cmpi eq, %arg1, %c0_i32 : i32
    %1 = arith.extui %0 : i1 to i32
    %c0_i32_0 = arith.constant 0 : i32
    %2 = arith.cmpi ne, %1, %c0_i32_0 : i32
    scf.if %2 {
      %cst_49 = arith.constant 0.000000e+00 : f32
      %195 = vector.broadcast %cst_49 : f32 to vector<8x256xf32>
      %c0_50 = arith.constant 0 : index
      %c0_51 = arith.constant 0 : index
      %c0_52 = arith.constant 0 : index
      %196 = vector.load %arg4[%c0_50, %c0_51, %c0_52] : memref<1x8x256xf32, #tpu.memory_space<vmem>>, vector<1x8x256xf32>
      %197 = vector.shape_cast %196 : vector<1x8x256xf32> to vector<8x256xf32>
      %198 = vector.shape_cast %195 : vector<8x256xf32> to vector<1x8x256xf32>
      tpu.vector_store %arg4[%c0_50, %c0_51, %c0_52], %198 {strides = array<i32>} : memref<1x8x256xf32, #tpu.memory_space<vmem>>, vector<1x8x256xf32>,
    } else {
    }
    %c1_i32 = arith.constant 1 : i32
    %3 = arith.muli %arg0, %c1_i32 : i32
    %4 = arith.addi %3, %arg1 : i32
    %c256_i32 = arith.constant 256 : i32
    %5 = arith.muli %4, %c256_i32 : i32
    %cst = arith.constant 0.000000e+00 : f32
    %6 = vector.broadcast %cst : f32 to vector<1x256xf32>
    %c0_i32_1 = arith.constant 0 : i32
    %c256_i32_2 = arith.constant 256 : i32
    %7 = arith.muli %c0_i32_1, %c256_i32_2 : i32
    %8 = tpu.assume_multiple %7, 256 : i32
    %c0 = arith.constant 0 : index
    %9 = arith.index_cast %8 : i32 to index
    %10 = vector.load %arg2[%c0, %9] : memref<30x256xf32, #tpu.memory_space<vmem>>, vector<30x256xf32>
    %c0_3 = arith.constant 0 : index
    %11 = arith.index_cast %8 : i32 to index
    %12 = vector.load %arg3[%c0_3, %11] : memref<30x256xf32, #tpu.memory_space<vmem>>, vector<30x256xf32>
    %13 = arith.addi %5, %8 : i32
    %14 = tpu.iota {dimensions = array<i32: 1>} : vector<1x256xi32>
    %15 = vector.broadcast %13 : i32 to vector<1x256xi32>
    %16 = arith.addi %15, %14 : vector<1x256xi32>
    %c98_i32 = arith.constant 98 : i32
    %17 = vector.broadcast %c98_i32 : i32 to vector<1x256xi32>
    %18 = arith.cmpi slt, %16, %17 : vector<1x256xi32>
    %19 = vector.extract_strided_slice %12 {offsets = [4, 0], sizes = [1, 256], strides = [1, 1]} : vector<30x256xf32> to vector<1x256xf32>
    %cst_4 = arith.constant 0.000000e+00 : f32
    %20 = vector.broadcast %cst_4 : f32 to vector<1x256xf32>
    %21 = arith.cmpf ogt, %19, %20 : vector<1x256xf32>
    %22 = arith.andi %18, %21 : vector<1x256xi1>
    %cst_5 = arith.constant 0.000000e+00 : f32
    %23 = vector.broadcast %cst_5 : f32 to vector<1x256xf32>
    %24 = arith.cmpf oeq, %19, %23 : vector<1x256xf32>
    %25 = arith.andi %18, %24 : vector<1x256xi1>
    %26 = vector.extract_strided_slice %10 {offsets = [0, 0], sizes = [5, 256], strides = [1, 1]} : vector<30x256xf32> to vector<5x256xf32>
    %27 = vector.extract_strided_slice %12 {offsets = [0, 0], sizes = [5, 256], strides = [1, 1]} : vector<30x256xf32> to vector<5x256xf32>
    %28 = vector.extract_strided_slice %26 {offsets = [0, 0], sizes = [1, 256], strides = [1, 1]} : vector<5x256xf32> to vector<1x256xf32>
    %29 = vector.extract_strided_slice %26 {offsets = [1, 0], sizes = [1, 256], strides = [1, 1]} : vector<5x256xf32> to vector<1x256xf32>
    %30 = vector.extract_strided_slice %26 {offsets = [2, 0], sizes = [1, 256], strides = [1, 1]} : vector<5x256xf32> to vector<1x256xf32>
    %31 = vector.extract_strided_slice %26 {offsets = [3, 0], sizes = [1, 256], strides = [1, 1]} : vector<5x256xf32> to vector<1x256xf32>
    %32 = vector.extract_strided_slice %27 {offsets = [0, 0], sizes = [1, 256], strides = [1, 1]} : vector<5x256xf32> to vector<1x256xf32>
    %33 = vector.extract_strided_slice %27 {offsets = [1, 0], sizes = [1, 256], strides = [1, 1]} : vector<5x256xf32> to vector<1x256xf32>
    %34 = vector.extract_strided_slice %27 {offsets = [2, 0], sizes = [1, 256], strides = [1, 1]} : vector<5x256xf32> to vector<1x256xf32>
    %35 = vector.extract_strided_slice %27 {offsets = [3, 0], sizes = [1, 256], strides = [1, 1]} : vector<5x256xf32> to vector<1x256xf32>
    %36 = arith.minimumf %30, %34 : vector<1x256xf32>
    %37 = arith.maximumf %28, %32 : vector<1x256xf32>
    %38 = arith.subf %36, %37 : vector<1x256xf32>
    %cst_6 = arith.constant 0.000000e+00 : f32
    %39 = vector.broadcast %cst_6 : f32 to vector<1x256xf32>
    %40 = arith.maximumf %38, %39 : vector<1x256xf32>
    %41 = arith.minimumf %31, %35 : vector<1x256xf32>
    %42 = arith.maximumf %29, %33 : vector<1x256xf32>
    %43 = arith.subf %41, %42 : vector<1x256xf32>
    %cst_7 = arith.constant 0.000000e+00 : f32
    %44 = vector.broadcast %cst_7 : f32 to vector<1x256xf32>
    %45 = arith.maximumf %43, %44 : vector<1x256xf32>
    %46 = arith.mulf %40, %45 : vector<1x256xf32>
    %47 = arith.subf %30, %28 : vector<1x256xf32>
    %48 = arith.subf %31, %29 : vector<1x256xf32>
    %49 = arith.mulf %47, %48 : vector<1x256xf32>
    %50 = arith.subf %34, %32 : vector<1x256xf32>
    %51 = arith.subf %35, %33 : vector<1x256xf32>
    %52 = arith.mulf %50, %51 : vector<1x256xf32>
    %53 = arith.addf %49, %52 : vector<1x256xf32>
    %54 = arith.subf %53, %46 : vector<1x256xf32>
    %cst_8 = arith.constant 1.000000e+00 : f32
    %55 = vector.broadcast %cst_8 : f32 to vector<1x256xf32>
    %56 = arith.select %22, %54, %55 : vector<1x256xi1>, vector<1x256xf32>
    %57 = arith.divf %46, %56 : vector<1x256xf32>
    %58 = vector.extract_strided_slice %10 {offsets = [5, 0], sizes = [5, 256], strides = [1, 1]} : vector<30x256xf32> to vector<5x256xf32>
    %59 = vector.extract_strided_slice %12 {offsets = [0, 0], sizes = [5, 256], strides = [1, 1]} : vector<30x256xf32> to vector<5x256xf32>
    %60 = vector.extract_strided_slice %58 {offsets = [0, 0], sizes = [1, 256], strides = [1, 1]} : vector<5x256xf32> to vector<1x256xf32>
    %61 = vector.extract_strided_slice %58 {offsets = [1, 0], sizes = [1, 256], strides = [1, 1]} : vector<5x256xf32> to vector<1x256xf32>
    %62 = vector.extract_strided_slice %58 {offsets = [2, 0], sizes = [1, 256], strides = [1, 1]} : vector<5x256xf32> to vector<1x256xf32>
    %63 = vector.extract_strided_slice %58 {offsets = [3, 0], sizes = [1, 256], strides = [1, 1]} : vector<5x256xf32> to vector<1x256xf32>
    %64 = vector.extract_strided_slice %59 {offsets = [0, 0], sizes = [1, 256], strides = [1, 1]} : vector<5x256xf32> to vector<1x256xf32>
    %65 = vector.extract_strided_slice %59 {offsets = [1, 0], sizes = [1, 256], strides = [1, 1]} : vector<5x256xf32> to vector<1x256xf32>
    %66 = vector.extract_strided_slice %59 {offsets = [2, 0], sizes = [1, 256], strides = [1, 1]} : vector<5x256xf32> to vector<1x256xf32>
    %67 = vector.extract_strided_slice %59 {offsets = [3, 0], sizes = [1, 256], strides = [1, 1]} : vector<5x256xf32> to vector<1x256xf32>
    %68 = arith.minimumf %62, %66 : vector<1x256xf32>
    %69 = arith.maximumf %60, %64 : vector<1x256xf32>
    %70 = arith.subf %68, %69 : vector<1x256xf32>
    %cst_9 = arith.constant 0.000000e+00 : f32
    %71 = vector.broadcast %cst_9 : f32 to vector<1x256xf32>
    %72 = arith.maximumf %70, %71 : vector<1x256xf32>
    %73 = arith.minimumf %63, %67 : vector<1x256xf32>
    %74 = arith.maximumf %61, %65 : vector<1x256xf32>
    %75 = arith.subf %73, %74 : vector<1x256xf32>
    %cst_10 = arith.constant 0.000000e+00 : f32
    %76 = vector.broadcast %cst_10 : f32 to vector<1x256xf32>
    %77 = arith.maximumf %75, %76 : vector<1x256xf32>
    %78 = arith.mulf %72, %77 : vector<1x256xf32>
    %79 = arith.subf %62, %60 : vector<1x256xf32>
    %80 = arith.subf %63, %61 : vector<1x256xf32>
    %81 = arith.mulf %79, %80 : vector<1x256xf32>
    %82 = arith.subf %66, %64 : vector<1x256xf32>
    %83 = arith.subf %67, %65 : vector<1x256xf32>
    %84 = arith.mulf %82, %83 : vector<1x256xf32>
    %85 = arith.addf %81, %84 : vector<1x256xf32>
    %86 = arith.subf %85, %78 : vector<1x256xf32>
    %cst_11 = arith.constant 1.000000e+00 : f32
    %87 = vector.broadcast %cst_11 : f32 to vector<1x256xf32>
    %88 = arith.select %22, %86, %87 : vector<1x256xi1>, vector<1x256xf32>
    %89 = arith.divf %78, %88 : vector<1x256xf32>
    %90 = arith.cmpf ogt, %89, %57 : vector<1x256xf32>
    %91 = arith.maximumf %57, %89 : vector<1x256xf32>
    %92 = vector.extract_strided_slice %10 {offsets = [5, 0], sizes = [5, 256], strides = [1, 1]} : vector<30x256xf32> to vector<5x256xf32>
    %93 = vector.extract_strided_slice %10 {offsets = [0, 0], sizes = [5, 256], strides = [1, 1]} : vector<30x256xf32> to vector<5x256xf32>
    %94 = vector.shape_cast %90 : vector<1x256xi1> to vector<1x256xi1>
    %95 = vector.broadcast %94 : vector<1x256xi1> to vector<5x256xi1>
    %96 = arith.select %95, %92, %93 : vector<5x256xi1>, vector<5x256xf32>
    %97 = vector.extract_strided_slice %12 {offsets = [5, 0], sizes = [5, 256], strides = [1, 1]} : vector<30x256xf32> to vector<5x256xf32>
    %98 = vector.extract_strided_slice %12 {offsets = [0, 0], sizes = [5, 256], strides = [1, 1]} : vector<30x256xf32> to vector<5x256xf32>
    %99 = vector.shape_cast %90 : vector<1x256xi1> to vector<1x256xi1>
    %100 = vector.broadcast %99 : vector<1x256xi1> to vector<5x256xi1>
    %101 = arith.select %100, %97, %98 : vector<5x256xi1>, vector<5x256xf32>
    %102 = vector.extract_strided_slice %96 {offsets = [0, 0], sizes = [1, 256], strides = [1, 1]} : vector<5x256xf32> to vector<1x256xf32>
    %103 = vector.extract_strided_slice %101 {offsets = [0, 0], sizes = [1, 256], strides = [1, 1]} : vector<5x256xf32> to vector<1x256xf32>
    %104 = arith.subf %102, %103 : vector<1x256xf32>
    %105 = arith.mulf %104, %104 : vector<1x256xf32>
    %106 = vector.extract_strided_slice %96 {offsets = [1, 0], sizes = [1, 256], strides = [1, 1]} : vector<5x256xf32> to vector<1x256xf32>
    %107 = vector.extract_strided_slice %101 {offsets = [1, 0], sizes = [1, 256], strides = [1, 1]} : vector<5x256xf32> to vector<1x256xf32>
    %108 = arith.subf %106, %107 : vector<1x256xf32>
    %109 = arith.mulf %108, %108 : vector<1x256xf32>
    %110 = arith.addf %105, %109 : vector<1x256xf32>
    %111 = vector.extract_strided_slice %96 {offsets = [2, 0], sizes = [1, 256], strides = [1, 1]} : vector<5x256xf32> to vector<1x256xf32>
    %cst_12 = arith.constant 0.000000e+00 : f32
    %112 = vector.broadcast %cst_12 : f32 to vector<1x256xf32>
    %113 = arith.select %22, %111, %112 : vector<1x256xi1>, vector<1x256xf32>
    %114 = math.sqrt %113 : vector<1x256xf32>
    %115 = vector.extract_strided_slice %96 {offsets = [3, 0], sizes = [1, 256], strides = [1, 1]} : vector<5x256xf32> to vector<1x256xf32>
    %cst_13 = arith.constant 0.000000e+00 : f32
    %116 = vector.broadcast %cst_13 : f32 to vector<1x256xf32>
    %117 = arith.select %22, %115, %116 : vector<1x256xi1>, vector<1x256xf32>
    %118 = math.sqrt %117 : vector<1x256xf32>
    %119 = vector.extract_strided_slice %101 {offsets = [2, 0], sizes = [1, 256], strides = [1, 1]} : vector<5x256xf32> to vector<1x256xf32>
    %cst_14 = arith.constant 0.000000e+00 : f32
    %120 = vector.broadcast %cst_14 : f32 to vector<1x256xf32>
    %121 = arith.select %22, %119, %120 : vector<1x256xi1>, vector<1x256xf32>
    %122 = math.sqrt %121 : vector<1x256xf32>
    %123 = vector.extract_strided_slice %101 {offsets = [3, 0], sizes = [1, 256], strides = [1, 1]} : vector<5x256xf32> to vector<1x256xf32>
    %cst_15 = arith.constant 0.000000e+00 : f32
    %124 = vector.broadcast %cst_15 : f32 to vector<1x256xf32>
    %125 = arith.select %22, %123, %124 : vector<1x256xi1>, vector<1x256xf32>
    %126 = math.sqrt %125 : vector<1x256xf32>
    %127 = arith.subf %114, %122 : vector<1x256xf32>
    %128 = arith.mulf %127, %127 : vector<1x256xf32>
    %129 = arith.subf %118, %126 : vector<1x256xf32>
    %130 = arith.mulf %129, %129 : vector<1x256xf32>
    %131 = arith.addf %128, %130 : vector<1x256xf32>
    %132 = vector.extract_strided_slice %96 {offsets = [4, 0], sizes = [1, 256], strides = [1, 1]} : vector<5x256xf32> to vector<1x256xf32>
    %133 = arith.subf %132, %91 : vector<1x256xf32>
    %134 = arith.mulf %133, %133 : vector<1x256xf32>
    %135 = vector.extract_strided_slice %10 {offsets = [4, 0], sizes = [1, 256], strides = [1, 1]} : vector<30x256xf32> to vector<1x256xf32>
    %136 = vector.extract_strided_slice %12 {offsets = [4, 0], sizes = [1, 256], strides = [1, 1]} : vector<30x256xf32> to vector<1x256xf32>
    %137 = arith.subf %135, %136 : vector<1x256xf32>
    %138 = arith.mulf %137, %137 : vector<1x256xf32>
    %139 = vector.extract_strided_slice %10 {offsets = [9, 0], sizes = [1, 256], strides = [1, 1]} : vector<30x256xf32> to vector<1x256xf32>
    %140 = vector.extract_strided_slice %12 {offsets = [9, 0], sizes = [1, 256], strides = [1, 1]} : vector<30x256xf32> to vector<1x256xf32>
    %141 = arith.subf %139, %140 : vector<1x256xf32>
    %142 = arith.mulf %141, %141 : vector<1x256xf32>
    %143 = arith.addf %138, %142 : vector<1x256xf32>
    %144 = vector.extract_strided_slice %10 {offsets = [10, 0], sizes = [20, 256], strides = [1, 1]} : vector<30x256xf32> to vector<20x256xf32>
    %145 = vector.extract_strided_slice %12 {offsets = [10, 0], sizes = [20, 256], strides = [1, 1]} : vector<30x256xf32> to vector<20x256xf32>
    %146 = arith.subf %144, %145 : vector<20x256xf32>
    %147 = arith.mulf %146, %146 : vector<20x256xf32>
    %cst_16 = arith.constant dense<0.000000e+00> : vector<256xf32>
    %148 = vector.multi_reduction <add>, %147, %cst_16 [0] : vector<20x256xf32> to vector<256xf32>
    %149 = vector.shape_cast %148 : vector<256xf32> to vector<1x256xf32>
    %cst_17 = arith.constant 0.000000e+00 : f32
    %150 = vector.broadcast %cst_17 : f32 to vector<1x256xf32>
    %151 = arith.select %22, %110, %150 : vector<1x256xi1>, vector<1x256xf32>
    %152 = arith.addf %6, %151 : vector<1x256xf32>
    %cst_18 = arith.constant 0.000000e+00 : f32
    %153 = vector.broadcast %cst_18 : f32 to vector<1x256xf32>
    %154 = arith.select %22, %131, %153 : vector<1x256xi1>, vector<1x256xf32>
    %155 = arith.addf %6, %154 : vector<1x256xf32>
    %cst_19 = arith.constant 0.000000e+00 : f32
    %156 = vector.broadcast %cst_19 : f32 to vector<1x256xf32>
    %157 = arith.select %22, %134, %156 : vector<1x256xi1>, vector<1x256xf32>
    %158 = arith.addf %6, %157 : vector<1x256xf32>
    %cst_20 = arith.constant 0.000000e+00 : f32
    %159 = vector.broadcast %cst_20 : f32 to vector<1x256xf32>
    %160 = arith.select %25, %143, %159 : vector<1x256xi1>, vector<1x256xf32>
    %161 = arith.addf %6, %160 : vector<1x256xf32>
    %cst_21 = arith.constant 0.000000e+00 : f32
    %162 = vector.broadcast %cst_21 : f32 to vector<1x256xf32>
    %163 = arith.select %22, %149, %162 : vector<1x256xi1>, vector<1x256xf32>
    %164 = arith.addf %6, %163 : vector<1x256xf32>
    %c1_i32_22 = arith.constant 1 : i32
    %c0_23 = arith.constant 0 : index
    %c0_24 = arith.constant 0 : index
    %c0_25 = arith.constant 0 : index
    %165 = vector.load %arg4[%c0_23, %c0_24, %c0_25] : memref<1x8x256xf32, #tpu.memory_space<vmem>>, vector<1x1x256xf32>
    %166 = vector.shape_cast %165 : vector<1x1x256xf32> to vector<1x256xf32>
    %167 = arith.addf %166, %152 : vector<1x256xf32>
    %c0_26 = arith.constant 0 : index
    %c0_27 = arith.constant 0 : index
    %c0_28 = arith.constant 0 : index
    %168 = vector.load %arg4[%c0_26, %c0_27, %c0_28] : memref<1x8x256xf32, #tpu.memory_space<vmem>>, vector<1x1x256xf32>
    %169 = vector.shape_cast %168 : vector<1x1x256xf32> to vector<1x256xf32>
    %170 = vector.shape_cast %167 : vector<1x256xf32> to vector<1x1x256xf32>
    tpu.vector_store %arg4[%c0_26, %c0_27, %c0_28], %170 {strides = array<i32>} : memref<1x8x256xf32, #tpu.memory_space<vmem>>, vector<1x1x256xf32>,
    %c0_29 = arith.constant 0 : index
    %c1 = arith.constant 1 : index
    %c0_30 = arith.constant 0 : index
    %171 = vector.load %arg4[%c0_29, %c1, %c0_30] : memref<1x8x256xf32, #tpu.memory_space<vmem>>, vector<1x1x256xf32>
    %172 = vector.shape_cast %171 : vector<1x1x256xf32> to vector<1x256xf32>
    %173 = arith.addf %172, %155 : vector<1x256xf32>
    %c0_31 = arith.constant 0 : index
    %c1_32 = arith.constant 1 : index
    %c0_33 = arith.constant 0 : index
    %174 = vector.load %arg4[%c0_31, %c1_32, %c0_33] : memref<1x8x256xf32, #tpu.memory_space<vmem>>, vector<1x1x256xf32>
    %175 = vector.shape_cast %174 : vector<1x1x256xf32> to vector<1x256xf32>
    %176 = vector.shape_cast %173 : vector<1x256xf32> to vector<1x1x256xf32>
    tpu.vector_store %arg4[%c0_31, %c1_32, %c0_33], %176 {strides = array<i32>} : memref<1x8x256xf32, #tpu.memory_space<vmem>>, vector<1x1x256xf32>,
    %c0_34 = arith.constant 0 : index
    %c2 = arith.constant 2 : index
    %c0_35 = arith.constant 0 : index
    %177 = vector.load %arg4[%c0_34, %c2, %c0_35] : memref<1x8x256xf32, #tpu.memory_space<vmem>>, vector<1x1x256xf32>
    %178 = vector.shape_cast %177 : vector<1x1x256xf32> to vector<1x256xf32>
    %179 = arith.addf %178, %158 : vector<1x256xf32>
    %c0_36 = arith.constant 0 : index
    %c2_37 = arith.constant 2 : index
    %c0_38 = arith.constant 0 : index
    %180 = vector.load %arg4[%c0_36, %c2_37, %c0_38] : memref<1x8x256xf32, #tpu.memory_space<vmem>>, vector<1x1x256xf32>
    %181 = vector.shape_cast %180 : vector<1x1x256xf32> to vector<1x256xf32>
    %182 = vector.shape_cast %179 : vector<1x256xf32> to vector<1x1x256xf32>
    tpu.vector_store %arg4[%c0_36, %c2_37, %c0_38], %182 {strides = array<i32>} : memref<1x8x256xf32, #tpu.memory_space<vmem>>, vector<1x1x256xf32>,
    %c0_39 = arith.constant 0 : index
    %c3 = arith.constant 3 : index
    %c0_40 = arith.constant 0 : index
    %183 = vector.load %arg4[%c0_39, %c3, %c0_40] : memref<1x8x256xf32, #tpu.memory_space<vmem>>, vector<1x1x256xf32>
    %184 = vector.shape_cast %183 : vector<1x1x256xf32> to vector<1x256xf32>
    %185 = arith.addf %184, %161 : vector<1x256xf32>
    %c0_41 = arith.constant 0 : index
    %c3_42 = arith.constant 3 : index
    %c0_43 = arith.constant 0 : index
    %186 = vector.load %arg4[%c0_41, %c3_42, %c0_43] : memref<1x8x256xf32, #tpu.memory_space<vmem>>, vector<1x1x256xf32>
    %187 = vector.shape_cast %186 : vector<1x1x256xf32> to vector<1x256xf32>
    %188 = vector.shape_cast %185 : vector<1x256xf32> to vector<1x1x256xf32>
    tpu.vector_store %arg4[%c0_41, %c3_42, %c0_43], %188 {strides = array<i32>} : memref<1x8x256xf32, #tpu.memory_space<vmem>>, vector<1x1x256xf32>,
    %c0_44 = arith.constant 0 : index
    %c4 = arith.constant 4 : index
    %c0_45 = arith.constant 0 : index
    %189 = vector.load %arg4[%c0_44, %c4, %c0_45] : memref<1x8x256xf32, #tpu.memory_space<vmem>>, vector<1x1x256xf32>
    %190 = vector.shape_cast %189 : vector<1x1x256xf32> to vector<1x256xf32>
    %191 = arith.addf %190, %164 : vector<1x256xf32>
    %c0_46 = arith.constant 0 : index
    %c4_47 = arith.constant 4 : index
    %c0_48 = arith.constant 0 : index
    %192 = vector.load %arg4[%c0_46, %c4_47, %c0_48] : memref<1x8x256xf32, #tpu.memory_space<vmem>>, vector<1x1x256xf32>
    %193 = vector.shape_cast %192 : vector<1x1x256xf32> to vector<1x256xf32>
    %194 = vector.shape_cast %191 : vector<1x256xf32> to vector<1x1x256xf32>
    tpu.vector_store %arg4[%c0_46, %c4_47, %c0_48], %194 {strides = array<i32>} : memref<1x8x256xf32, #tpu.memory_space<vmem>>, vector<1x1x256xf32>,
    return
  }
  func.func @transform_0(%arg0: i32, %arg1: i32) -> (i32, i32) {
    %c1_i32 = arith.constant 1 : i32
    %0 = arith.muli %arg0, %c1_i32 : i32
    %1 = arith.addi %0, %arg1 : i32
    %c0_i32 = arith.constant 0 : i32
    %2 = arith.minsi %1, %c0_i32 : i32
    %c0_i32_0 = arith.constant 0 : i32
    %c0_i32_1 = arith.constant 0 : i32
    return %c0_i32_0, %2 : i32, i32
  }
  func.func @transform_1(%arg0: i32, %arg1: i32) -> (i32, i32) {
    %c1_i32 = arith.constant 1 : i32
    %0 = arith.muli %arg0, %c1_i32 : i32
    %1 = arith.addi %0, %arg1 : i32
    %c0_i32 = arith.constant 0 : i32
    %2 = arith.minsi %1, %c0_i32 : i32
    %c0_i32_0 = arith.constant 0 : i32
    %c0_i32_1 = arith.constant 0 : i32
    return %c0_i32_0, %2 : i32, i32
  }
  func.func @transform_2(%arg0: i32, %arg1: i32) -> (i32, i32, i32) {
    %c0_i32 = arith.constant 0 : i32
    %c0_i32_0 = arith.constant 0 : i32
    %c0_i32_1 = arith.constant 0 : i32
    return %arg0, %c0_i32, %c0_i32_0 : i32, i32, i32
  }
}

</mosaic_0001>

<bundles_post_ra>
// kernel: tpu_custom_call.1
= control target key start
LH: loop header
LB: loop body
LE: loop exit
PB: predicated region body
PF: predicated region fallthrough
CT: control target
= control target key end

     0   :  { %7 = vsyncpa [#allocation3], 0  ;;  %s916_s0 = inlined_call_operand.hbm [shape: f32[30,256], index: 0, kind: input, shape index: {}]   ;;  %s917_s1 = inlined_call_operand.hbm [shape: f32[30,256], index: 1, kind: input, shape index: {}]   ;;  %s918_s2 = inlined_call_operand.hbm [shape: f32[1,8,256], index: 2, kind: output, shape index: {}]  }
   0x1   :  { %8 = vsyncpa [#allocation6], 0 }
   0x2   :  { %9 = vsyncpa [#allocation4], 0  ;;  %s733_s9 = smov [#allocation2]   ;;  %s661_s13 = scalar_lea.hbm %s916_s0, 1024 }
   0x3   :  { %s21_s10 = sshll.u32 %s733_s9, 4  ;;  %p662_p0 = scmp.ne.s32.totalorder %s916_s0, %s661_s13  ;;  %s22_s10 = int_to_ptr.vmem [resolvable:$true] %s21_s10 }
   0x4   :  { %p665_p1 = scmp.lt.u32.totalorder %s661_s13, %s916_s0 }
   0x6   :  { %p667_p2 = pnand %p665_p1, %p662_p0 }
   0x8   :  { %670 = shalt.err (!%p667_p2)
}
   0x9   :  { %s671_s18 = scalar_lea.vmem %s22_s10, 1024  ;;  %p676_p4 = scmp.lt.s32.totalorder %s22_s10, %s22_s10 }
   0xa   :  { %p672_p3 = scmp.ne.s32.totalorder %s22_s10, %s671_s18  ;;  %p677_p5 = scmp.lt.s32.totalorder %s671_s18, %s671_s18 }
   0xc   :  { %p678_p6 = por %p677_p5, %p676_p4 }
   0xe   :  { %p679_p7 = pnand %p678_p6, %p672_p3 }
  0x10   :  { %682 = shalt.err (!%p679_p7)
}
  0x11   :  { %s734_s19 = smov 256   ;;  %s735_s20 = smov 16  }
  0x12   :  { %27 = dma.hbm_to_vmem [thread:$0]  %s916_s0, 1024, %s22_s10, [#allocation3], %s734_s19, %s734_s19, %s735_s20  }
  0x13   :  { %s736_s23 = smov [#allocation5]   ;;  %s683_s27 = scalar_lea.hbm %s917_s1, 1024 }
  0x14   :  { %s39_s24 = sshll.u32 %s736_s23, 4  ;;  %p684_p8 = scmp.ne.s32.totalorder %s917_s1, %s683_s27  ;;  %s40_s24 = int_to_ptr.vmem [resolvable:$true] %s39_s24 }
  0x15   :  { %p687_p9 = scmp.lt.u32.totalorder %s683_s27, %s917_s1 }
  0x17   :  { %p689_p10 = pnand %p687_p9, %p684_p8 }
  0x19   :  { %692 = shalt.err (!%p689_p10)
}
  0x1a   :  { %s693_s4 = scalar_lea.vmem %s40_s24, 1024  ;;  %p698_p12 = scmp.lt.s32.totalorder %s40_s24, %s40_s24 }
  0x1b   :  { %p694_p11 = scmp.ne.s32.totalorder %s40_s24, %s693_s4  ;;  %p699_p13 = scmp.lt.s32.totalorder %s693_s4, %s693_s4 }
  0x1d   :  { %p700_p0 = por %p699_p13, %p698_p12 }
  0x1f   :  { %p701_p1 = pnand %p700_p0, %p694_p11 }
  0x21   :  { %704 = shalt.err (!%p701_p1)
}
  0x22   :  { %45 = dma.hbm_to_vmem [thread:$0]  %s917_s1, 1024, %s40_s24, [#allocation6], %s734_s19, %s734_s19, %s735_s20  }
  0x23   :  { %727 = dma.done.wait [#allocation3], 1024  }
  0x24   :  { %728 = vsyncadd [#allocation3], 4294966272 }
  0x25   :  { %729 = dma.done.wait [#allocation6], 1024  }
  0x26   :  { %730 = vsyncadd [#allocation6], 4294966272  ;;  %v737_v0 = vmov 0.0   ;;  %v85_v1 = vlaneseq  ;;  %v738_v2 = vmov 1966171168   ;;  %v787_v5 = vld [vmem:[#allocation2] sm:$0xff] }
  0x27   :  { %64 = vst [vmem:[#allocation7] sm:$0xff] %v737_v0  ;;  %65 = vst [vmem:[#allocation7 + $0x8] sm:$0xff] %v737_v0  ;;  %v782_v3 = vunpack.c.l.s4 %v738_v2  ;;  %v789_v6 = vld [vmem:[#allocation5] sm:$0xff]  ;;  %v791_v7 = vld [vmem:[#allocation2 + $0x10] sm:$0xff]  ;;  %v125_v10 = vrot.slane %v787_v5, 6  ;;  %vm435_vm0 = vcmask 1045504  }
  0x28   :  { %v785_v4 = vand.u32 127, %v85_v1  ;;  %v101_v8 = vmin.f32 %v787_v5, %v789_v6  ;;  %v103_v9 = vmax.f32 %v787_v5, %v789_v6  ;;  %v141_v11 = vrot.slane %v789_v6, 6  ;;  %v72_v18 = vld [vmem:[#allocation2 + $0x20] sm:$0xff]  ;;  %v809_v19 = vld [vmem:[#allocation5 + $0x10] sm:$0xff]  ;;  %s740_s1 = smov [#allocation7]  }
  0x29   :  { %v800_v12 = vrot.slane %v789_v6, 3  ;;  %v509_v13 = vunpack.c.0.s8 %v782_v3  ;;  %vm93_vm2 = vcmp.gt.f32.partialorder %v789_v6, 0.0  ;;  %v129_v15 = vsub.f32 %v787_v5, %v125_v10  ;;  %v74_v24 = vld [vmem:[#allocation2 + $0x30] sm:$0x3f]  ;;  %v80_v28 = vld [vmem:[#allocation5 + $0x20] sm:$0xff]  ;;  %s627_s6 = sshll.u32 %s740_s1, 4  ;;  %s628_s6 = int_to_ptr.vmem [resolvable:$true] %s627_s6 }
  0x2a   :  { %vm91_vm1 = vcmp.lt.s32.totalorder %v785_v4, 98  ;;  %v107_v14 = vrot.slane %v103_v9, 6  ;;  %v209_v16 = vsub.f32 %v791_v7, %v125_v10  ;;  %v407_v17 = vsub.f32 %v787_v5, %v789_v6  ;;  %v82_v29 = vld [vmem:[#allocation5 + $0x30] sm:$0x3f]  ;;  %s705_s7 = scalar_lea.vmem %s628_s6, 256  ;;  %p710_p3 = scmp.lt.s32.totalorder %s628_s6, %s628_s6 }
  0x2b   :  { %vm453_vm3 = vcmask 1043456   ;;  %v145_v20 = vsub.f32 %v789_v6, %v141_v11  ;;  %v181_v21 = vmin.f32 %v787_v5, %v800_v12  ;;  %v183_v22 = vmax.f32 %v787_v5, %v800_v12  ;;  %vm831_vm6 = vmand %vm91_vm1, %vm93_vm2  ;;  %p706_p2 = scmp.ne.s32.totalorder %s628_s6, %s705_s7  ;;  %p711_p4 = scmp.lt.s32.totalorder %s705_s7, %s705_s7 }
  0x2c   :  { %v195_v23 = vmin.f32 %v791_v7, %v800_v12  ;;  %v111_v25 = vsub.f32 %v101_v8, %v107_v14  ;;  %v133_v26 = vrot.slane %v129_v15, 1  ;;  %v213_v27 = vrot.slane %v209_v16, 1 }
  0x2d   :  { %vm97_vm4 = vcmp.eq.f32.partialorder %v789_v6, 0.0  ;;  %v149_v30 = vrot.slane %v145_v20, 1  ;;  %v187_v31 = vrot.slane %v183_v22, 6  ;;  %v411_v32 = vsub.f32 %v791_v7, %v809_v19  ;;  %p712_p5 = por %p711_p4, %p710_p3 }
  0x2e   :  { %v423_v33 = vsub.f32 %v72_v18, %v80_v28  ;;  %v113_v34 = vmax.f32 %v111_v25, 0.0  ;;  %v137_v35 = vmul.f32 %v133_v26, %v129_v15  ;;  %v217_v36 = vmul.f32 %v213_v27, %v129_v15  ;;  %vm99_vm5 = vmand %vm91_vm1, %vm97_vm4 }
  0x2f   :  { %v425_v37 = vsub.f32 %v74_v24, %v82_v29  ;;  %v153_v38 = vmul.f32 %v149_v30, %v145_v20  ;;  %v191_v39 = vsub.f32 %v181_v21, %v187_v31  ;;  %v197_v40 = vsub.f32 %v195_v23, %v187_v31  ;;  %p713_p6 = pnand %p712_p5, %p706_p2 }
  0x30   :  { %v413_v41 = vmul.f32 %v411_v32, %v411_v32  ;;  %v117_v42 = vrot.slane %v113_v34, 1  ;;  %v409_v43 = vmul.f32 %v407_v17, %v407_v17  ;;  %v427_v44 = vmul.f32 %v423_v33, %v423_v33 }
  0x31   :  { %v429_v45 = vmul.f32 %v425_v37, %v425_v37  ;;  %v155_v46 = vadd.f32 %v153_v38, %v137_v35  ;;  %v193_v47 = vmax.f32 %v191_v39, 0.0  ;;  %v199_v48 = vmax.f32 %v197_v40, 0.0  ;;  %v599_v39 = vld [vmem:[#allocation7 + $0x4] ss:$8 sm:$0x3] }
  0x32   :  { %v221_v49 = vrot.slane %v153_v38, 3  ;;  %v121_v50 = vmul.f32 %v117_v42, %v113_v34  ;;  %v417_v51 = vrot.slane %v413_v41, 5  ;;  %v436_v52 = vrot.slane %v413_v41, 2 }
  0x33   :  { %v437_v53 = vrot.slane %v427_v44, 2  ;;  %v203_v54 = vrot.slane %v199_v48, 1  ;;  %v266_v56 = vshrl.u32 %v85_v1, 7  ;;  %v442_v57 = vrot.slane %v429_v45, 2 }
  0x34   :  { %v225_v55 = vadd.f32 %v221_v49, %v217_v36  ;;  %v157_v58 = vsub.f32 %v155_v46, %v121_v50  ;;  %v421_v59 = vadd.f32 %v417_v51, %v409_v43  ;;  %vm847_vm7 = vcmp.lt.s32.totalorder %v85_v1, 256 }
  0x35   :  { %v438_v60 = vsel %vm435_vm0, %v436_v52, %v437_v53  ;;  %v207_v62 = vmul.f32 %v203_v54, %v193_v47  ;;  %v835_v63 = vsub.s32 %v509_v13, %v266_v56  ;;  %v443_v2 = vsel %vm435_vm0, %v437_v53, %v442_v57  ;;  %v576_v13 = vld [vmem:[#allocation7 + $0x3] ss:$8 sm:$0x3] }
  0x36   :  { %v454_v3 = vsel %vm453_vm3, %v442_v57, 0.0  ;;  %v161_v8 = vrot.slane %v157_v58, 6  ;;  %v495_v9 = vsel %vm99_vm5, %v421_v59, 0.0  ;;  %v452_v10 = vadd.f32 %v443_v2, %v438_v60 }
  0x37   :  { %v227_v11 = vsub.f32 %v225_v55, %v207_v62  ;;  %v579_v14 = vcombine.high %v495_v9, %v737_v0  ;;  %v267_v37 = vsub.s32 7, %v266_v56  ;;  %v739_v42 = vmov 0  }
  0x38   :  { %v165_v4 = vsel %vm831_vm6, %v161_v8, 1.0  ;;  %v455_v15 = vadd.f32 %v454_v3, %v452_v10  ;;  %v275_v44 = vrot.slane %v787_v5, 3 }
  0x39   :  { %v169_v16 = vrot.slane %v165_v4, 2  ;;  %v231_v17 = vrot.slane %v227_v11, 3  ;;  %v586_v18 = vrot.slane %v579_v14, %v835_v63 }
  0x3a   :  { %v456_v20 = vrot.slane %v455_v15, 4 }
  0x3b   :  { %649 = vrcp.f32 %v169_v16  ;;  %v235_v21 = vsel %vm831_vm6, %v231_v17, 1.0  ;;  %v593_v22 = vrot.slane %v586_v18, %v835_v63  ;;  %v503_v18 = vld [vmem:[#allocation7] ss:$8 sm:$0x3] }
  0x3c   :  { %v239_v23 = vrot.slane %v235_v21, 5  ;;  %v457_v25 = vadd.f32 %v456_v20, %v455_v15 }
  0x3d   :  { %v595_v26 = vadd.f32 %v593_v22, %v576_v13 }
  0x3e   :  { %651 = vrcp.f32 %v239_v23  ;;  %v458_v27 = vrot.slane %v457_v25, 2 }
  0x3f   :  { %596 = vst.msk [vmem:[#allocation7 + $0x3] ss:$8 sm:$0x3] %vm847_vm7, %v595_v26  ;;  %v553_v26 = vld [vmem:[#allocation7 + $0x2] ss:$8 sm:$0x3] }
  0x40   :  { %v459_v28 = vadd.f32 %v458_v27, %v457_v25 }
  0x42   :  { %v460_v29 = vrot.slane %v459_v28, 1 }
  0x44   :  { %v461_v30 = vadd.f32 %v460_v29, %v459_v28 }
  0x45   :  { %v650_v31 = vpop.eup %649 }
  0x46   :  { %v174_v32 = vmul.f32 %v650_v31, %v121_v50  ;;  %v499_v33 = vsel %vm831_vm6, %v461_v30, 0.0 }
  0x47   :  { %v602_v1 = vcombine.high %v499_v33, %v737_v0 }
  0x48   :  { %v652_v34 = vpop.eup %651  ;;  %v249_v35 = vrot.slane %v174_v32, 3 }
  0x49   :  { %v244_v36 = vmul.f32 %v652_v34, %v207_v62  ;;  %v609_v38 = vrot.slane %v602_v1, %v835_v63 }
  0x4b   :  { %vm253_vm8 = vcmp.gt.f32.partialorder %v244_v36, %v249_v35  ;;  %v257_v40 = vrot.slane %v244_v36, 5  ;;  %v616_v41 = vrot.slane %v609_v38, %v835_v63 }
  0x4c   :  { %v263_v43 = vsel %vm253_vm8, 1, %v739_v42 }
  0x4d   :  { %v268_v45 = vrot.slane %v263_v43, %v267_v37  ;;  %v261_v46 = vmax.f32 %v174_v32, %v257_v40  ;;  %v618_v47 = vadd.f32 %v616_v41, %v599_v39 }
  0x4f   :  { %vm273_vm9 = vcmp.eq.s32.totalorder %v268_v45, 1  ;;  %v399_v48 = vrot.slane %v261_v46, 1  ;;  %619 = vst.msk [vmem:[#allocation7 + $0x4] ss:$8 sm:$0x3] %vm847_vm7, %v618_v47 }
  0x50   :  { %v279_v49 = vsel %vm273_vm9, %v787_v5, %v275_v44  ;;  %v281_v50 = vsel %vm273_vm9, %v791_v7, %v275_v44  ;;  %v283_v51 = vsel %vm273_vm9, %v789_v6, %v800_v12  ;;  %v285_v52 = vsel %vm273_vm9, %v809_v19, %v800_v12 }
  0x51   :  { %v287_v53 = vsub.f32 %v279_v49, %v283_v51  ;;  %v301_v54 = vrot.slane %v279_v49, 3  ;;  %v323_v55 = vrot.slane %v281_v50, 4  ;;  %v345_v56 = vrot.slane %v283_v51, 3  ;;  %v530_v49 = vld [vmem:[#allocation7 + $0x1] ss:$8 sm:$0x3] }
  0x52   :  { %v367_v57 = vrot.slane %v285_v52, 4  ;;  %v403_v12 = vsub.f32 %v281_v50, %v399_v48 }
  0x53   :  { %v289_v58 = vmul.f32 %v287_v53, %v287_v53  ;;  %v305_v59 = vsel %vm831_vm6, %v301_v54, 0.0  ;;  %v327_v5 = vsel %vm831_vm6, %v323_v55, 0.0  ;;  %v349_v7 = vsel %vm831_vm6, %v345_v56, 0.0 }
  0x54   :  { %653 = vrsqrt.f32 %v305_v59  ;;  %v371_v6 = vsel %vm831_vm6, %v367_v57, 0.0  ;;  %v405_v62 = vmul.f32 %v403_v12, %v403_v12  ;;  %vm309_vm10 = vcmp.eq.f32.partialorder %v305_v59, inf }
  0x55   :  { %v293_v19 = vrot.slane %v289_v58, 1  ;;  %655 = vrsqrt.f32 %v327_v5  ;;  %vm311_vm11 = vcmp.eq.f32.partialorder %v305_v59, 0.0  ;;  %v312_v11 = vand.u32 2147483648, %v305_v59 }
  0x56   :  { %657 = vrsqrt.f32 %v349_v7  ;;  %v487_v3 = vrot.slane %v405_v62, 5  ;;  %vm331_vm12 = vcmp.eq.f32.partialorder %v327_v5, inf  ;;  %vm333_vm13 = vcmp.eq.f32.partialorder %v327_v5, 0.0 }
  0x57   :  { %v297_v60 = vadd.f32 %v293_v19, %v289_v58  ;;  %659 = vrsqrt.f32 %v371_v6  ;;  %v334_v16 = vand.u32 2147483648, %v327_v5  ;;  %vm353_vm14 = vcmp.eq.f32.partialorder %v349_v7, inf }
  0x58   :  { %v491_v10 = vsel %vm831_vm6, %v487_v3, 0.0  ;;  %vm355_vm15 = vcmp.eq.f32.partialorder %v349_v7, 0.0  ;;  %v356_v20 = vand.u32 2147483648, %v349_v7  ;;  %vm375_vm0 = vcmp.eq.f32.partialorder %v371_v6, inf }
  0x59   :  { %v473_v2 = vrot.slane %v297_v60, 1  ;;  %v556_v14 = vcombine.high %v491_v10, %v737_v0  ;;  %vm377_vm1 = vcmp.eq.f32.partialorder %v371_v6, 0.0  ;;  %v378_v30 = vand.u32 2147483648, %v371_v6 }
  0x5b   :  { %v477_v8 = vsel %vm831_vm6, %v473_v2, 0.0  ;;  %v563_v21 = vrot.slane %v556_v14, %v835_v63 }
  0x5c   :  { %v506_v9 = vcombine.high %v477_v8, %v737_v0 }
  0x5d   :  { %v570_v31 = vrot.slane %v563_v21, %v835_v63 }
  0x5e   :  { %v654_v4 = vpop.eup %653  ;;  %v513_v15 = vrot.slane %v506_v9, %v835_v63 }
  0x5f   :  { %v656_v17 = vpop.eup %655  ;;  %v308_v13 = vmul.f32 %v654_v4, %v305_v59  ;;  %v572_v37 = vadd.f32 %v570_v31, %v553_v26 }
  0x60   :  { %v658_v22 = vpop.eup %657  ;;  %v520_v23 = vrot.slane %v513_v15, %v835_v63  ;;  %v330_v25 = vmul.f32 %v656_v17, %v327_v5 }
  0x61   :  { %v660_v27 = vpop.eup %659  ;;  %v310_v28 = vsel %vm309_vm10, %v305_v59, %v308_v13  ;;  %v352_v29 = vmul.f32 %v658_v22, %v349_v7  ;;  %573 = vst.msk [vmem:[#allocation7 + $0x2] ss:$8 sm:$0x3] %vm847_vm7, %v572_v37 }
  0x62   :  { %v522_v32 = vadd.f32 %v520_v23, %v503_v18  ;;  %v313_v33 = vsel %vm311_vm11, %v312_v11, %v310_v28  ;;  %v332_v1 = vsel %vm331_vm12, %v327_v5, %v330_v25  ;;  %v374_v34 = vmul.f32 %v660_v27, %v371_v6 }
  0x63   :  { %v335_v35 = vsel %vm333_vm13, %v334_v16, %v332_v1  ;;  %v354_v36 = vsel %vm353_vm14, %v349_v7, %v352_v29 }
  0x64   :  { %527 = vst.msk [vmem:[#allocation7] ss:$8 sm:$0x3] %vm847_vm7, %v522_v32  ;;  %v357_v38 = vsel %vm355_vm15, %v356_v20, %v354_v36  ;;  %v376_v39 = vsel %vm375_vm0, %v371_v6, %v374_v34 }
  0x65   :  { %v379_v40 = vsel %vm377_vm1, %v378_v30, %v376_v39  ;;  %v387_v41 = vsub.f32 %v313_v33, %v357_v38 }
  0x66   :  { %v391_v42 = vsub.f32 %v335_v35, %v379_v40 }
  0x67   :  { %v389_v43 = vmul.f32 %v387_v41, %v387_v41 }
  0x68   :  { %v393_v44 = vmul.f32 %v391_v42, %v391_v42 }
  0x6a   :  { %v395_v45 = vadd.f32 %v393_v44, %v389_v43 }
  0x6c   :  { %v481_v46 = vsel %vm831_vm6, %v395_v45, 0.0 }
  0x6d   :  { %v533_v47 = vcombine.high %v481_v46, %v737_v0 }
  0x6f   :  { %v540_v48 = vrot.slane %v533_v47, %v835_v63 }
  0x71   :  { %v547_v50 = vrot.slane %v540_v48, %v835_v63 }
  0x73   :  { %v549_v51 = vadd.f32 %v547_v50, %v530_v49 }
  0x75   :  { %550 = vst.msk [vmem:[#allocation7 + $0x1] ss:$8 sm:$0x3] %vm847_vm7, %v549_v51 }
  0x76   :  { %716 = shalt.err (!%p713_p6)
}
  0x77   :  { %s717_s10 = scalar_lea.hbm %s918_s2, 256 }
  0x78   :  { %p718_p7 = scmp.ne.s32.totalorder %s918_s2, %s717_s10  ;;  %p721_p8 = scmp.lt.u32.totalorder %s717_s10, %s918_s2 }
  0x7a   :  { %p723_p9 = pnand %p721_p8, %p718_p7 }
  0x7c   :  { %726 = shalt.err (!%p723_p9)
}
  0x7d   :  { %630 = dma.vmem_to_hbm [thread:$0]  %s628_s6, 256, %s918_s2, [#allocation4]  }
  0x7e   :  { %731 = dma.done.wait [#allocation4], 256  }
  0x7f   :  { %732 = vsyncadd [#allocation4], 4294967040 }
  0x80   :  { %634 = vsyncpa [#allocation3], 1 }
  0x81   :  { %635 = vsyncpa [#allocation6], 1 }
  0x82   :  { %636 = vsyncpa [#allocation4], 1 }

</bundles_post_ra>
